<compile_context>
chip_gen: v5e
topology: v5e:2x2
jax: 0.10.0
libtpu: 0.0.40
codegen_flags: <defaults>
</compile_context>

<pallas_src>
import numpy as np
import jax
import jax.numpy as jnp
from jax.experimental import pallas as pl
from jax.experimental.pallas import tpu as pltpu

EXPERT_SEP = -1
N_EXPERTS = 3
N_CLASSES = 3                     # ExpertConfig.n_classes
HIDDEN = 32                       # synthetic expert hidden_dim (DistilBERT would be 768)
CAT = N_EXPERTS * HIDDEN          # 96 concatenated pooled features
ARB_HIDDEN = 128                  # ExpertConfig.arbiter_hidden_dim
LANE = 128                        # lane-dense width (>= CAT, == ARB_HIDDEN, >= N_CLASSES)
BP = 8                            # batch sublane tile (f32 sublanes)
W_ROWS = 3 * LANE + 8             # 392 = W1bd | FW | WA2 | one (8,128) bias tile
VOCAB = 64
SEG_LEN = 8
BATCH = 2


def fused_experts_arbiter_kernel(x_ref, w_ref, out_ref):
    """Fused expert classifier L1 + folded (classifier L2 @ arbiter L1) + arbiter L2.

    x_ref  : (BP, 128)  pooled CLS features, experts concatenated along lanes
                        (cols 0:CAT live, CAT:128 zero)
    w_ref  : (392, 128) weight slab:
                        rows   0:128  block-diagonal expert W1 (zero-padded)
                        rows 128:256  stacked fw_e = w2_e @ wa1_e (rows CAT:128 zero)
                        rows 256:384  arbiter W2, output padded to 128 lanes
                        rows 384:392  bias tile: row0=b1_cat, row1=fb, row2=ba2_pad
    out_ref: (BP, 128)  padded arbiter logits (cols 0:N_CLASSES live)
    """
    x = x_ref[...]
    w1 = w_ref[0:LANE, :]                       # tile-aligned static slices (no copies)
    fw = w_ref[LANE:2 * LANE, :]
    wa2 = w_ref[2 * LANE:3 * LANE, :]
    biases = w_ref[3 * LANE:3 * LANE + 8, :]    # one aligned (8,128) load
    b1 = biases[0:1, :]
    fb = biases[1:2, :]
    ba2 = biases[2:3, :]

    # expert classifier layer 1 for all experts at once (block-diagonal K=128 matmul)
    h1 = jnp.maximum(jnp.dot(x, w1, preferred_element_type=jnp.float32) + b1, 0.0)
    # classifier layer 2 and arbiter layer 1 pre-folded: h1 @ FW == sum_e h_e @ (w2_e @ wa1_e)
    h2 = jnp.maximum(jnp.dot(h1, fw, preferred_element_type=jnp.float32) + fb, 0.0)
    # arbiter layer 2 (output lane-padded to 128)
    out_ref[...] = jnp.dot(h2, wa2, preferred_element_type=jnp.float32) + ba2


def expert_layer_with_arbiter(expert_inputs, params):
    """expert_inputs: list of N_EXPERTS (emb (B, L_e, H) f32, mask (B, L_e) f32)."""
    B = expert_inputs[0][0].shape[0]

    # --- encoder-stub pooling in plain JAX (hoisted out of the kernel) ------------
    pooled = []
    for emb, mask in expert_inputs:
        msum = jnp.sum(mask, axis=1, keepdims=True)
        pooled.append(jnp.sum(emb * mask[:, :, None], axis=1) / jnp.maximum(msum, 1.0))
    pooled_cat = jnp.concatenate(pooled, axis=1)                         # (B, CAT=96)

    # pad batch to a multiple of 8 sublanes, features to 128 lanes
    b_pad = max(BP, ((B + BP - 1) // BP) * BP)
    x = jnp.zeros((b_pad, LANE), jnp.float32).at[:B, :CAT].set(pooled_cat)

    # --- build the single lane-dense weight slab -----------------------------------
    a = params["arbiter"]
    wa1 = a["w1"]                                                        # (E*C, ARB)
    w1bd = jnp.zeros((LANE, LANE), jnp.float32)
    b1cat = jnp.zeros((1, LANE), jnp.float32)
    fwstk = jnp.zeros((LANE, ARB_HIDDEN), jnp.float32)
    fb = a["b1"]                                                         # (1, ARB)
    for e in range(N_EXPERTS):
        p = params["experts"][e]
        r = e * HIDDEN
        wa1_e = wa1[e * N_CLASSES:(e + 1) * N_CLASSES]                   # (C, ARB)
        w1bd = w1bd.at[r:r + HIDDEN, r:r + HIDDEN].set(p["w1"])
        b1cat = b1cat.at[0, r:r + HIDDEN].set(p["b1"][0])
        # algebraic fold (no nonlinearity between classifier L2 and arbiter L1):
        #   cat @ wa1 + ba1 == sum_e h_e @ (w2_e @ wa1_e) + (sum_e b2_e @ wa1_e + ba1)
        fwstk = fwstk.at[r:r + HIDDEN, :].set(p["w2"] @ wa1_e)
        fb = fb + p["b2"] @ wa1_e
    wa2_pad = jnp.zeros((ARB_HIDDEN, LANE), jnp.float32).at[:, :N_CLASSES].set(a["w2"])
    ba2_pad = jnp.zeros((1, LANE), jnp.float32).at[:, :N_CLASSES].set(a["b2"])
    bias_tile = jnp.concatenate(
        [b1cat, fb, ba2_pad, jnp.zeros((5, LANE), jnp.float32)], axis=0)  # (8, 128)
    w_slab = jnp.concatenate([w1bd, fwstk, wa2_pad, bias_tile], axis=0)   # (392, 128)

    # --- fused kernel call ----------------------------------------------------------
    out_pad = pl.pallas_call(
        fused_experts_arbiter_kernel,
        out_shape=jax.ShapeDtypeStruct((b_pad, LANE), jnp.float32),
        grid=(b_pad // BP,),
        in_specs=[pl.BlockSpec((BP, LANE), lambda i: (i, 0)),
                  pl.BlockSpec((W_ROWS, LANE), lambda i: (0, 0))],
        out_specs=pl.BlockSpec((BP, LANE), lambda i: (i, 0)),
        compiler_params=pltpu.CompilerParams(
            dimension_semantics=("parallel",)),
    )(x, w_slab)
    return out_pad[:B, :N_CLASSES]


def reference(expert_inputs, params):
    """Pure-JAX reference of the ORIGINAL (unfolded) math, for correctness check."""
    outs = []
    for e, (emb, mask) in enumerate(expert_inputs):
        msum = jnp.sum(mask, axis=1, keepdims=True)
        pooled = jnp.sum(emb * mask[:, :, None], axis=1) / jnp.maximum(msum, 1.0)
        p = params["experts"][e]
        h = jnp.maximum(pooled @ p["w1"] + p["b1"], 0.0)
        outs.append(h @ p["w2"] + p["b2"])
    cat = jnp.concatenate(outs, axis=1)
    a = params["arbiter"]
    h = jnp.maximum(cat @ a["w1"] + a["b1"], 0.0)
    return h @ a["w2"] + a["b2"]


def init_params(key):
    keys = jax.random.split(key, 4 * N_EXPERTS + 4 + N_EXPERTS)
    ki = iter(keys)
    experts = []
    emb_tables = []
    for _ in range(N_EXPERTS):
        emb_tables.append(jax.random.normal(next(ki), (VOCAB, HIDDEN), jnp.float32) * 0.1)
        experts.append({
            "w1": jax.random.normal(next(ki), (HIDDEN, HIDDEN), jnp.float32) * 0.1,
            "b1": jax.random.normal(next(ki), (1, HIDDEN), jnp.float32) * 0.01,
            "w2": jax.random.normal(next(ki), (HIDDEN, N_CLASSES), jnp.float32) * 0.1,
            "b2": jax.random.normal(next(ki), (1, N_CLASSES), jnp.float32) * 0.01,
        })
    arbiter = {
        "w1": jax.random.normal(next(ki), (N_CLASSES * N_EXPERTS, ARB_HIDDEN), jnp.float32) * 0.1,
        "b1": jax.random.normal(next(ki), (1, ARB_HIDDEN), jnp.float32) * 0.01,
        "w2": jax.random.normal(next(ki), (ARB_HIDDEN, N_CLASSES), jnp.float32) * 0.1,
        "b2": jax.random.normal(next(ki), (1, N_CLASSES), jnp.float32) * 0.01,
    }
    return {"experts": experts, "arbiter": arbiter}, emb_tables


if __name__ == "__main__":
    key = jax.random.PRNGKey(0)
    pkey, tkey, mkey = jax.random.split(key, 3)
    params, emb_tables = init_params(pkey)

    # (B, S) token matrix: each expert segment is TERMINATED by an EXPERT_SEP column,
    # exactly as the PyTorch module expects (one separator per expert):
    #   [ seg0 (8) | -1 | seg1 (8) | -1 | seg2 (8) | -1 ]  ->  S = 27
    segs = [
        np.asarray(jax.random.randint(k, (BATCH, SEG_LEN), 1, VOCAB, dtype=jnp.int32))
        for k in jax.random.split(tkey, N_EXPERTS)
    ]
    sep_col = np.full((BATCH, 1), EXPERT_SEP, dtype=np.int32)
    inputs_np = np.concatenate(
        [segs[0], sep_col, segs[1], sep_col, segs[2], sep_col], axis=1
    )  # (B, 27) int32
    masks_np = np.asarray(
        jax.random.bernoulli(mkey, 0.9, inputs_np.shape)
    ).astype(np.int32)

    # --- glue: separator-based slicing (mirrors torch.where(inputs[0] == -1)) ---
    sep_idxs = [0] + list(np.where(inputs_np[0] == EXPERT_SEP)[0])
    assert len(sep_idxs) - 1 == N_EXPERTS, (
        f"Mismatch in number of separator indices ({len(sep_idxs) - 1}) "
        f"and number of experts ({N_EXPERTS})!")
    expert_inputs = []
    for e in range(N_EXPERTS):
        start = sep_idxs[e] if e == 0 else sep_idxs[e] + 1
        stop = sep_idxs[e + 1]
        masks_np[:, start] = 1  # keep at least one valid token per segment
        tok = jnp.asarray(inputs_np[:, start:stop], dtype=jnp.int32)        # (B, L)
        msk = jnp.asarray(masks_np[:, start:stop], dtype=jnp.float32)       # (B, L)
        # TODO(synk): HF AutoModel encoder replaced by an embedding lookup (plain-JAX
        # gather); the classifier heads + arbiter run fused in the Pallas kernel.
        emb = jnp.take(emb_tables[e], tok, axis=0)                          # (B, L, H)
        expert_inputs.append((emb, msk))

    out = expert_layer_with_arbiter(expert_inputs, params)
    out = jax.block_until_ready(out)

    ref = reference(expert_inputs, params)
    assert out.shape == (BATCH, N_CLASSES)
    assert np.allclose(np.asarray(out), np.asarray(ref), rtol=1e-4, atol=1e-4), (
        "Pallas kernel output mismatch vs JAX reference"
    )
    print("KERNEL_OK")
</pallas_src>

<mosaic_0001>
module attributes {stable_mosaic.version = 11 : i64} {
  func.func @fused_experts_arbiter_kernel(%arg0: i32, %arg1: memref<8x128xf32, #tpu.memory_space<vmem>>, %arg2: memref<392x128xf32, #tpu.memory_space<vmem>>, %arg3: memref<8x128xf32, #tpu.memory_space<vmem>>) attributes {dimension_semantics = [#tpu.dimension_semantics<parallel>], iteration_bounds = array<i64: 1>, scalar_prefetch = 0 : i64, scratch_operands = 0 : i64, tpu.core_type = #tpu.core_type<tc>, window_params = [{transform_indices = @transform_0, window_bounds = array<i64: 8, 128>}, {pipeline_mode = #tpu.pipeline_mode<synchronous>, transform_indices = @transform_1, window_bounds = array<i64: 392, 128>}, {transform_indices = @transform_2, window_bounds = array<i64: 8, 128>}]} {
    %c0 = arith.constant 0 : index
    %c0_0 = arith.constant 0 : index
    %0 = vector.load %arg1[%c0, %c0_0] : memref<8x128xf32, #tpu.memory_space<vmem>>, vector<8x128xf32>
    %c0_1 = arith.constant 0 : index
    %c0_2 = arith.constant 0 : index
    %1 = vector.load %arg2[%c0_1, %c0_2] : memref<392x128xf32, #tpu.memory_space<vmem>>, vector<128x128xf32>
    %c128 = arith.constant 128 : index
    %c0_3 = arith.constant 0 : index
    %2 = vector.load %arg2[%c128, %c0_3] : memref<392x128xf32, #tpu.memory_space<vmem>>, vector<128x128xf32>
    %c256 = arith.constant 256 : index
    %c0_4 = arith.constant 0 : index
    %3 = vector.load %arg2[%c256, %c0_4] : memref<392x128xf32, #tpu.memory_space<vmem>>, vector<128x128xf32>
    %c384 = arith.constant 384 : index
    %c0_5 = arith.constant 0 : index
    %4 = vector.load %arg2[%c384, %c0_5] : memref<392x128xf32, #tpu.memory_space<vmem>>, vector<8x128xf32>
    %5 = vector.extract_strided_slice %4 {offsets = [0, 0], sizes = [1, 128], strides = [1, 1]} : vector<8x128xf32> to vector<1x128xf32>
    %6 = vector.extract_strided_slice %4 {offsets = [1, 0], sizes = [1, 128], strides = [1, 1]} : vector<8x128xf32> to vector<1x128xf32>
    %7 = vector.extract_strided_slice %4 {offsets = [2, 0], sizes = [1, 128], strides = [1, 1]} : vector<8x128xf32> to vector<1x128xf32>
    %cst = arith.constant dense<0.000000e+00> : vector<8x128xf32>
    %8 = tpu.matmul %0, %1, %cst {dimension_numbers = #tpu.dot_dimension_numbers<[1], [0], [0], [1], [0, 0, 1, 1], [], []>} : vector<8x128xf32>, vector<128x128xf32>, vector<8x128xf32> -> vector<8x128xf32>
    %9 = vector.broadcast %5 : vector<1x128xf32> to vector<8x128xf32>
    %10 = arith.addf %8, %9 : vector<8x128xf32>
    %cst_6 = arith.constant 0.000000e+00 : f32
    %11 = vector.broadcast %cst_6 : f32 to vector<8x128xf32>
    %12 = arith.maximumf %10, %11 : vector<8x128xf32>
    %cst_7 = arith.constant dense<0.000000e+00> : vector<8x128xf32>
    %13 = tpu.matmul %12, %2, %cst_7 {dimension_numbers = #tpu.dot_dimension_numbers<[1], [0], [0], [1], [0, 0, 1, 1], [], []>} : vector<8x128xf32>, vector<128x128xf32>, vector<8x128xf32> -> vector<8x128xf32>
    %14 = vector.broadcast %6 : vector<1x128xf32> to vector<8x128xf32>
    %15 = arith.addf %13, %14 : vector<8x128xf32>
    %cst_8 = arith.constant 0.000000e+00 : f32
    %16 = vector.broadcast %cst_8 : f32 to vector<8x128xf32>
    %17 = arith.maximumf %15, %16 : vector<8x128xf32>
    %cst_9 = arith.constant dense<0.000000e+00> : vector<8x128xf32>
    %18 = tpu.matmul %17, %3, %cst_9 {dimension_numbers = #tpu.dot_dimension_numbers<[1], [0], [0], [1], [0, 0, 1, 1], [], []>} : vector<8x128xf32>, vector<128x128xf32>, vector<8x128xf32> -> vector<8x128xf32>
    %19 = vector.broadcast %7 : vector<1x128xf32> to vector<8x128xf32>
    %20 = arith.addf %18, %19 : vector<8x128xf32>
    %c0_10 = arith.constant 0 : index
    %c0_11 = arith.constant 0 : index
    %21 = vector.load %arg3[%c0_10, %c0_11] : memref<8x128xf32, #tpu.memory_space<vmem>>, vector<8x128xf32>
    tpu.vector_store %arg3[%c0_10, %c0_11], %20 {strides = array<i32>} : memref<8x128xf32, #tpu.memory_space<vmem>>, vector<8x128xf32>,
    return
  }
  func.func @transform_0(%arg0: i32) -> (i32, i32) {
    %c0_i32 = arith.constant 0 : i32
    %c0_i32_0 = arith.constant 0 : i32
    return %arg0, %c0_i32 : i32, i32
  }
  func.func @transform_1(%arg0: i32) -> (i32, i32) {
    %c0_i32 = arith.constant 0 : i32
    %c0_i32_0 = arith.constant 0 : i32
    %c0_i32_1 = arith.constant 0 : i32
    return %c0_i32, %c0_i32_0 : i32, i32
  }
  func.func @transform_2(%arg0: i32) -> (i32, i32) {
    %c0_i32 = arith.constant 0 : i32
    %c0_i32_0 = arith.constant 0 : i32
    return %arg0, %c0_i32 : i32, i32
  }
}

</mosaic_0001>

<bundles_post_ra>
// kernel: tpu_custom_call.1
= control target key start
LH: loop header
LB: loop body
LE: loop exit
PB: predicated region body
PF: predicated region fallthrough
CT: control target
= control target key end

     0   :  { %7 = vsyncpa [#allocation3], 0  ;;  %s288_s0 = inlined_call_operand.hbm [shape: f32[8,128], index: 0, kind: input, shape index: {}]   ;;  %s289_s1 = inlined_call_operand.hbm [shape: f32[392,128], index: 1, kind: input, shape index: {}]   ;;  %s290_s2 = inlined_call_operand.hbm [shape: f32[8,128], index: 2, kind: output, shape index: {}]  }
   0x1   :  { %8 = vsyncpa [#allocation6], 0 }
   0x2   :  { %9 = vsyncpa [#allocation4], 0  ;;  %s15_s11 = sshll.u32 %s288_s0, 4  ;;  %s259_s12 = smov [#allocation2]   ;;  %s16_s11 = int_to_ptr.hbm [resolvable:$true] %s15_s11 }
   0x3   :  { %s17_s13 = sshll.u32 %s259_s12, 4  ;;  %s25_s16 = sshll.u32 %s289_s1, 4  ;;  %s18_s13 = int_to_ptr.vmem [resolvable:$true] %s17_s13  ;;  %s26_s16 = int_to_ptr.hbm [resolvable:$true] %s25_s16 }
   0x4   :  { %20 = dma.hbm_to_vmem [thread:$0]  %s16_s11, 128, %s18_s13, [#allocation3]  }
   0x5   :  { %s260_s17 = smov [#allocation5]   ;;  %s261_s19 = smov 128  }
   0x6   :  { %s27_s18 = sshll.u32 %s260_s17, 4  ;;  %s262_s20 = smov 8   ;;  %s28_s18 = int_to_ptr.vmem [resolvable:$true] %s27_s18 }
   0x7   :  { %33 = dma.hbm_to_vmem [thread:$0]  %s26_s16, 6272, %s28_s18, [#allocation6], %s261_s19, %s261_s19, %s262_s20  }
   0x8   :  { %253 = dma.done.wait [#allocation3], 128  }
   0x9   :  { %254 = vsyncadd [#allocation3], 4294967168 }
   0xa   :  { %255 = dma.done.wait [#allocation6], 6272  }
   0xb   :  { %256 = vsyncadd [#allocation6], 4294961024  ;;  %v58_v0 = vld [vmem:[#allocation5 + $0x78] sm:$0xff]  ;;  %v57_v1 = vld [vmem:[#allocation5 + $0x70] sm:$0xff]  ;;  %s263_s0 = smov [#allocation7]   ;;  %s165_s23 = sshll.u32 %s290_s2, 4  ;;  %s166_s23 = int_to_ptr.hbm [resolvable:$true] %s165_s23 }
   0xc   :  { %93 = vmatpush.msra.mxu0 %v58_v0  ;;  %v56_v2 = vld [vmem:[#allocation5 + $0x68] sm:$0xff]  ;;  %v55_v3 = vld [vmem:[#allocation5 + $0x60] sm:$0xff]  ;;  %v74_v4 = vld [vmem:[#allocation5 + $0xf8] sm:$0xff]  ;;  %s163_s1 = sshll.u32 %s263_s0, 4  ;;  %s164_s1 = int_to_ptr.vmem [resolvable:$true] %s163_s1 }
   0xd   :  { %v54_v5 = vld [vmem:[#allocation5 + $0x58] sm:$0xff]  ;;  %115 = vmatpush.msra.mxu1 %v74_v4  ;;  %v73_v6 = vld [vmem:[#allocation5 + $0xf0] sm:$0xff]  ;;  %v72_v7 = vld [vmem:[#allocation5 + $0xe8] sm:$0xff] }
   0xe   :  { %94 = vmatpush.msra.mxu0 %v57_v1  ;;  %v53_v8 = vld [vmem:[#allocation5 + $0x50] sm:$0xff]  ;;  %v71_v9 = vld [vmem:[#allocation5 + $0xe0] sm:$0xff]  ;;  %v52_v10 = vld [vmem:[#allocation5 + $0x48] sm:$0xff] }
   0xf   :  { %116 = vmatpush.msra.mxu1 %v73_v6  ;;  %v70_v11 = vld [vmem:[#allocation5 + $0xd8] sm:$0xff]  ;;  %v51_v12 = vld [vmem:[#allocation5 + $0x40] sm:$0xff]  ;;  %v69_v13 = vld [vmem:[#allocation5 + $0xd0] sm:$0xff] }
  0x10   :  { %95 = vmatpush.msra.mxu0 %v56_v2  ;;  %v50_v14 = vld [vmem:[#allocation5 + $0x38] sm:$0xff]  ;;  %v68_v15 = vld [vmem:[#allocation5 + $0xc8] sm:$0xff]  ;;  %v49_v16 = vld [vmem:[#allocation5 + $0x30] sm:$0xff] }
  0x11   :  { %117 = vmatpush.msra.mxu1 %v72_v7  ;;  %v67_v17 = vld [vmem:[#allocation5 + $0xc0] sm:$0xff]  ;;  %v48_v18 = vld [vmem:[#allocation5 + $0x28] sm:$0xff]  ;;  %v66_v19 = vld [vmem:[#allocation5 + $0xb8] sm:$0xff] }
  0x12   :  { %96 = vmatpush.msra.mxu0 %v55_v3  ;;  %v47_v20 = vld [vmem:[#allocation5 + $0x20] sm:$0xff]  ;;  %v65_v21 = vld [vmem:[#allocation5 + $0xb0] sm:$0xff]  ;;  %v46_v22 = vld [vmem:[#allocation5 + $0x18] sm:$0xff] }
  0x13   :  { %118 = vmatpush.msra.mxu1 %v71_v9  ;;  %v64_v23 = vld [vmem:[#allocation5 + $0xa8] sm:$0xff]  ;;  %v45_v24 = vld [vmem:[#allocation5 + $0x10] sm:$0xff]  ;;  %v63_v25 = vld [vmem:[#allocation5 + $0xa0] sm:$0xff] }
  0x14   :  { %97 = vmatpush.msra.mxu0 %v54_v5  ;;  %v44_v26 = vld [vmem:[#allocation5 + $0x8] sm:$0xff]  ;;  %v62_v27 = vld [vmem:[#allocation5 + $0x98] sm:$0xff]  ;;  %v43_v28 = vld [vmem:[#allocation5] sm:$0xff] }
  0x15   :  { %119 = vmatpush.msra.mxu1 %v70_v11  ;;  %v42_v29 = vld [vmem:[#allocation2] sm:$0xff]  ;;  %v61_v30 = vld [vmem:[#allocation5 + $0x90] sm:$0xff]  ;;  %v60_v31 = vld [vmem:[#allocation5 + $0x88] sm:$0xff] }
  0x16   :  { %98 = vmatpush.msra.mxu0 %v53_v8  ;;  %v59_v32 = vld [vmem:[#allocation5 + $0x80] sm:$0xff]  ;;  %v90_v33 = vld [vmem:[#allocation5 + $0x178] sm:$0xff]  ;;  %v89_v34 = vld [vmem:[#allocation5 + $0x170] sm:$0xff] }
  0x17   :  { %120 = vmatpush.msra.mxu1 %v69_v13  ;;  %137 = vmatpush.msra.mxu2 %v90_v33  ;;  %v88_v35 = vld [vmem:[#allocation5 + $0x168] sm:$0xff]  ;;  %v87_v36 = vld [vmem:[#allocation5 + $0x160] sm:$0xff]  ;;  %v86_v37 = vld [vmem:[#allocation5 + $0x158] sm:$0xff] }
  0x18   :  { %99 = vmatpush.msra.mxu0 %v52_v10  ;;  %v85_v38 = vld [vmem:[#allocation5 + $0x150] sm:$0xff]  ;;  %v84_v39 = vld [vmem:[#allocation5 + $0x148] sm:$0xff]  ;;  %v83_v40 = vld [vmem:[#allocation5 + $0x140] sm:$0xff] }
  0x19   :  { %121 = vmatpush.msra.mxu1 %v68_v15  ;;  %138 = vmatpush.msra.mxu2 %v89_v34  ;;  %v82_v41 = vld [vmem:[#allocation5 + $0x138] sm:$0xff]  ;;  %v81_v42 = vld [vmem:[#allocation5 + $0x130] sm:$0xff]  ;;  %v80_v43 = vld [vmem:[#allocation5 + $0x128] sm:$0xff] }
  0x1a   :  { %100 = vmatpush.msra.mxu0 %v51_v12  ;;  %v79_v44 = vld [vmem:[#allocation5 + $0x120] sm:$0xff]  ;;  %v78_v46 = vld [vmem:[#allocation5 + $0x118] sm:$0xff]  ;;  %v77_v51 = vld [vmem:[#allocation5 + $0x110] sm:$0xff] }
  0x1b   :  { %122 = vmatpush.msra.mxu1 %v67_v17  ;;  %139 = vmatpush.msra.mxu2 %v88_v35  ;;  %v91_v45 = vld [vmem:[#allocation5 + $0x180] sm:$0xff]  ;;  %v76_v52 = vld [vmem:[#allocation5 + $0x108] sm:$0xff] }
  0x1c   :  { %101 = vmatpush.msra.mxu0 %v50_v14  ;;  %v92_v47 = vperm.slane %v91_v45, 0  ;;  %v75_v53 = vld [vmem:[#allocation5 + $0x100] sm:$0xff]  ;;  %v114_v54 = vperm.slane %v91_v45, 1  ;;  %v136_v58 = vperm.slane %v91_v45, 2 }
  0x1d   :  { %123 = vmatpush.msra.mxu1 %v66_v19  ;;  %140 = vmatpush.msra.mxu2 %v87_v36 }
  0x1e   :  { %102 = vmatpush.msra.mxu0 %v49_v16 }
  0x1f   :  { %124 = vmatpush.msra.mxu1 %v65_v21  ;;  %141 = vmatpush.msra.mxu2 %v86_v37 }
  0x20   :  { %103 = vmatpush.msra.mxu0 %v48_v18 }
  0x21   :  { %125 = vmatpush.msra.mxu1 %v64_v23  ;;  %142 = vmatpush.msra.mxu2 %v85_v38 }
  0x22   :  { %104 = vmatpush.msra.mxu0 %v47_v20 }
  0x23   :  { %126 = vmatpush.msra.mxu1 %v63_v25  ;;  %143 = vmatpush.msra.mxu2 %v84_v39 }
  0x24   :  { %105 = vmatpush.msra.mxu0 %v46_v22 }
  0x25   :  { %127 = vmatpush.msra.mxu1 %v62_v27  ;;  %144 = vmatpush.msra.mxu2 %v83_v40 }
  0x26   :  { %106 = vmatpush.msra.mxu0 %v45_v24 }
  0x27   :  { %128 = vmatpush.msra.mxu1 %v61_v30  ;;  %145 = vmatpush.msra.mxu2 %v82_v41 }
  0x28   :  { %107 = vmatpush.msra.mxu0 %v44_v26 }
  0x29   :  { %129 = vmatpush.msra.mxu1 %v60_v31  ;;  %146 = vmatpush.msra.mxu2 %v81_v42 }
  0x2a   :  { %108 = vmatpush.msra.mxu0 %v43_v28 }
  0x2b   :  { %109 = vmatmul.f32.vlgmr.msra.gmra.mxu0 %v42_v29  ;;  %130 = vmatpush.msra.mxu1 %v59_v32 }
  0x2c   :  { %147 = vmatpush.msra.mxu2 %v80_v43 }
  0x2e   :  { %148 = vmatpush.msra.mxu2 %v79_v44 }
  0x30   :  { %149 = vmatpush.msra.mxu2 %v78_v46 }
  0x32   :  { %150 = vmatpush.msra.mxu2 %v77_v51 }
  0x34   :  { %151 = vmatpush.msra.mxu2 %v76_v52 }
  0x36   :  { %152 = vmatpush.msra.mxu2 %v75_v53 }
  0xa8   :  { %v110_v48 = vpop.f32.mrf.mxu0 }
  0xa9   :  { %v111_v49 = vadd.f32 %v110_v48, %v92_v47 }
  0xab   :  { %v113_v50 = vmax.f32 %v111_v49, 0.0 }
  0xad   :  { %131 = vmatmul.f32.vlgmr.msra.gmra.mxu1 %v113_v50 }
 0x12a   :  { %v132_v55 = vpop.f32.mrf.mxu1 }
 0x12b   :  { %v133_v56 = vadd.f32 %v132_v55, %v114_v54 }
 0x12d   :  { %v135_v57 = vmax.f32 %v133_v56, 0.0 }
 0x12f   :  { %153 = vmatmul.f32.vlgmr.msra.gmra.mxu2 %v135_v57 }
 0x1b2   :  { %v154_v59 = vpop.f32.mrf.mxu2 }
 0x1b3   :  { %v155_v60 = vadd.f32 %v154_v59, %v136_v58 }
 0x1b5   :  { %157 = vst [vmem:[#allocation7] sm:$0xff] %v155_v60 }
 0x1b6   :  { %168 = dma.vmem_to_hbm [thread:$0]  %s164_s1, 128, %s166_s23, [#allocation4]  }
 0x1b7   :  { %257 = dma.done.wait [#allocation4], 128  }
 0x1b8   :  { %258 = vsyncadd [#allocation4], 4294967168 }
 0x1b9   :  { %173 = vsyncpa [#allocation3], 1 }
 0x1ba   :  { %174 = vsyncpa [#allocation6], 1 }
 0x1bb   :  { %175 = vsyncpa [#allocation4], 1 }

</bundles_post_ra>
